<compile_context>
chip_gen: v6e
topology: v6e:2x2x1
jax: 0.10.0
libtpu: 0.0.40
codegen_flags: <defaults>
</compile_context>

<pallas_src>
import jax
import jax.numpy as jnp
from jax.experimental import pallas as pl
from jax.experimental.pallas import tpu as pltpu

STATE_SPACE = 48    # CliffWalking-v0 observation_space.n
ACTION_SPACE = 4    # CliffWalking-v0 action_space.n
H1 = 128
H2 = 64


def _round_up(x, m):
    return ((x + m - 1) // m) * m


def dqn_kernel(x_ref, w1_ref, b1_ref, w2_ref, b2_ref, w3_ref, b3_ref, o_ref):
    # x_ref: (TB, STATE_SPACE) f32 -> cast to bf16 in-kernel (hidden under input DMA).
    # TODO(synk): if the real CliffWalking input is a one-hot state index, replace this
    # first matmul with a scalar-prefetch row gather of the VMEM-resident w1 (w1[state]+b1).
    x = x_ref[...].astype(jnp.bfloat16)
    h1 = jnp.dot(x, w1_ref[...], preferred_element_type=jnp.float32) + b1_ref[...]
    h1 = jnp.maximum(h1, 0.0).astype(jnp.bfloat16)
    h2 = jnp.dot(h1, w2_ref[...], preferred_element_type=jnp.float32) + b2_ref[...]
    h2 = jnp.maximum(h2, 0.0).astype(jnp.bfloat16)
    # TODO(synk): if the consumer is argmax (action selection), fuse it here and emit (TB,1).
    o_ref[...] = jnp.dot(h2, w3_ref[...], preferred_element_type=jnp.float32) + b3_ref[...]


def prepare_params(params):
    """One-time weight prep (bf16 casts) cached across forward calls."""
    w1, b1, w2, b2, w3, b3 = params
    return (w1.astype(jnp.bfloat16), b1.astype(jnp.float32),
            w2.astype(jnp.bfloat16), b2.astype(jnp.float32),
            w3.astype(jnp.bfloat16), b3.astype(jnp.float32))


def dqn_forward(x, prepped, *, tb=1024):
    """x: [B, STATE_SPACE] f32. prepped: output of prepare_params. Returns [B, ACTION_SPACE] f32."""
    w1, b1, w2, b2, w3, b3 = prepped
    B, S = x.shape
    assert S == STATE_SPACE

    # >=2 grid steps for batches >8 rows (v7x megacore), capped at tb (v5e/v6e step-overhead
    # amortization).  TB is always a multiple of 8 sublanes.
    TB = min(tb, max(8, _round_up(pl.cdiv(B, 2), 8)))
    grid = (pl.cdiv(B, TB),)

    flops = 2 * B * (STATE_SPACE * H1 + H1 * H2 + H2 * ACTION_SPACE)
    bytes_accessed = (B * (STATE_SPACE * 4 + ACTION_SPACE * 4)
                      + 2 * (STATE_SPACE * H1 + H1 * H2 + H2 * ACTION_SPACE)
                      + 4 * (H1 + H2 + ACTION_SPACE))

    out = pl.pallas_call(
        dqn_kernel,
        out_shape=jax.ShapeDtypeStruct((B, ACTION_SPACE), jnp.float32),
        grid=grid,
        in_specs=[
            pl.BlockSpec((TB, STATE_SPACE), lambda i: (i, 0)),    # x tile (pipelined, f32)
            pl.BlockSpec((STATE_SPACE, H1), lambda i: (0, 0)),    # w1 (VMEM-resident, bf16)
            pl.BlockSpec((1, H1), lambda i: (0, 0)),              # b1 (f32)
            pl.BlockSpec((H1, H2), lambda i: (0, 0)),             # w2
            pl.BlockSpec((1, H2), lambda i: (0, 0)),              # b2
            pl.BlockSpec((H2, ACTION_SPACE), lambda i: (0, 0)),   # w3 (un-padded, N=4)
            pl.BlockSpec((1, ACTION_SPACE), lambda i: (0, 0)),    # b3
        ],
        out_specs=pl.BlockSpec((TB, ACTION_SPACE), lambda i: (i, 0)),
        compiler_params=pltpu.CompilerParams(
            dimension_semantics=("parallel",)),                   # megacore split on v7x
        cost_estimate=pl.CostEstimate(
            flops=flops, transcendentals=0, bytes_accessed=bytes_accessed),
    )(x, w1, b1, w2, b2, w3, b3)

    return out


def init_params(key):
    # Deterministic synthetic init (PyTorch-style uniform fan-in bounds), stored in f32.
    def linear(key, fan_in, fan_out):
        kw, kb = jax.random.split(key)
        bound = 1.0 / jnp.sqrt(fan_in)
        # stored as [in, out] (transposed relative to PyTorch's [out, in])
        w = jax.random.uniform(kw, (fan_in, fan_out), jnp.float32, -bound, bound)
        b = jax.random.uniform(kb, (1, fan_out), jnp.float32, -bound, bound)
        return w, b

    k1, k2, k3 = jax.random.split(key, 3)
    w1, b1 = linear(k1, STATE_SPACE, H1)
    w2, b2 = linear(k2, H1, H2)
    w3, b3 = linear(k3, H2, ACTION_SPACE)
    return (w1, b1, w2, b2, w3, b3)


def _reference(x, params):
    w1, b1, w2, b2, w3, b3 = params
    h1 = jnp.maximum(x @ w1 + b1, 0.0)
    h2 = jnp.maximum(h1 @ w2 + b2, 0.0)
    return h2 @ w3 + b3


if __name__ == "__main__":
    key = jax.random.PRNGKey(0)
    kp, kx1, kx2 = jax.random.split(key, 3)
    params = init_params(kp)
    prepped = prepare_params(params)   # bf16 weight prep done once, reused per call

    # Small action-selection batch (single grid step).
    x_small = jax.random.normal(kx1, (8, STATE_SPACE), jnp.float32)
    out_small = dqn_forward(x_small, prepped)
    jax.block_until_ready(out_small)
    ref_small = _reference(x_small, params)
    assert out_small.shape == (8, ACTION_SPACE)
    assert jnp.allclose(out_small, ref_small, atol=5e-2, rtol=5e-2), "mismatch (small batch)"

    # Non-divisible larger batch: exercises partial last block + 2-step parallel grid.
    x_big = jax.random.normal(kx2, (300, STATE_SPACE), jnp.float32)
    out_big = dqn_forward(x_big, prepped)
    jax.block_until_ready(out_big)
    ref_big = _reference(x_big, params)
    assert out_big.shape == (300, ACTION_SPACE)
    assert jnp.allclose(out_big, ref_big, atol=5e-2, rtol=5e-2), "mismatch (big batch)"

    print("KERNEL_OK")
</pallas_src>

<mosaic_0001>
module attributes {stable_mosaic.version = 11 : i64} {
  func.func @dqn_kernel(%arg0: i32, %arg1: memref<8x48xf32, #tpu.memory_space<vmem>>, %arg2: memref<48x128xbf16, #tpu.memory_space<vmem>>, %arg3: memref<1x128xf32, #tpu.memory_space<vmem>>, %arg4: memref<128x64xbf16, #tpu.memory_space<vmem>>, %arg5: memref<1x64xf32, #tpu.memory_space<vmem>>, %arg6: memref<64x4xbf16, #tpu.memory_space<vmem>>, %arg7: memref<1x4xf32, #tpu.memory_space<vmem>>, %arg8: memref<8x4xf32, #tpu.memory_space<vmem>>) attributes {dimension_semantics = [#tpu.dimension_semantics<parallel>], iteration_bounds = array<i64: 1>, scalar_prefetch = 0 : i64, scratch_operands = 0 : i64, tpu.core_type = #tpu.core_type<tc>, window_params = [{transform_indices = @transform_0, window_bounds = array<i64: 8, 48>}, {pipeline_mode = #tpu.pipeline_mode<synchronous>, transform_indices = @transform_1, window_bounds = array<i64: 48, 128>}, {pipeline_mode = #tpu.pipeline_mode<synchronous>, transform_indices = @transform_2, window_bounds = array<i64: 1, 128>}, {pipeline_mode = #tpu.pipeline_mode<synchronous>, transform_indices = @transform_3, window_bounds = array<i64: 128, 64>}, {pipeline_mode = #tpu.pipeline_mode<synchronous>, transform_indices = @transform_4, window_bounds = array<i64: 1, 64>}, {pipeline_mode = #tpu.pipeline_mode<synchronous>, transform_indices = @transform_5, window_bounds = array<i64: 64, 4>}, {pipeline_mode = #tpu.pipeline_mode<synchronous>, transform_indices = @transform_6, window_bounds = array<i64: 1, 4>}, {transform_indices = @transform_7, window_bounds = array<i64: 8, 4>}]} {
    %c0 = arith.constant 0 : index
    %c0_0 = arith.constant 0 : index
    %0 = vector.load %arg1[%c0, %c0_0] : memref<8x48xf32, #tpu.memory_space<vmem>>, vector<8x48xf32>
    %1 = arith.truncf %0 : vector<8x48xf32> to vector<8x48xbf16>
    %c0_1 = arith.constant 0 : index
    %c0_2 = arith.constant 0 : index
    %2 = vector.load %arg2[%c0_1, %c0_2] : memref<48x128xbf16, #tpu.memory_space<vmem>>, vector<48x128xbf16>
    %cst = arith.constant dense<0.000000e+00> : vector<8x128xf32>
    %3 = tpu.matmul %1, %2, %cst {dimension_numbers = #tpu.dot_dimension_numbers<[1], [0], [0], [1], [0, 0, 1, 1], [], []>} : vector<8x48xbf16>, vector<48x128xbf16>, vector<8x128xf32> -> vector<8x128xf32>
    %c0_3 = arith.constant 0 : index
    %c0_4 = arith.constant 0 : index
    %4 = vector.load %arg3[%c0_3, %c0_4] : memref<1x128xf32, #tpu.memory_space<vmem>>, vector<1x128xf32>
    %5 = vector.broadcast %4 : vector<1x128xf32> to vector<8x128xf32>
    %6 = arith.addf %3, %5 : vector<8x128xf32>
    %cst_5 = arith.constant 0.000000e+00 : f32
    %7 = vector.broadcast %cst_5 : f32 to vector<8x128xf32>
    %8 = arith.maximumf %6, %7 : vector<8x128xf32>
    %9 = arith.truncf %8 : vector<8x128xf32> to vector<8x128xbf16>
    %c0_6 = arith.constant 0 : index
    %c0_7 = arith.constant 0 : index
    %10 = vector.load %arg4[%c0_6, %c0_7] : memref<128x64xbf16, #tpu.memory_space<vmem>>, vector<128x64xbf16>
    %cst_8 = arith.constant dense<0.000000e+00> : vector<8x64xf32>
    %11 = tpu.matmul %9, %10, %cst_8 {dimension_numbers = #tpu.dot_dimension_numbers<[1], [0], [0], [1], [0, 0, 1, 1], [], []>} : vector<8x128xbf16>, vector<128x64xbf16>, vector<8x64xf32> -> vector<8x64xf32>
    %c0_9 = arith.constant 0 : index
    %c0_10 = arith.constant 0 : index
    %12 = vector.load %arg5[%c0_9, %c0_10] : memref<1x64xf32, #tpu.memory_space<vmem>>, vector<1x64xf32>
    %13 = vector.broadcast %12 : vector<1x64xf32> to vector<8x64xf32>
    %14 = arith.addf %11, %13 : vector<8x64xf32>
    %cst_11 = arith.constant 0.000000e+00 : f32
    %15 = vector.broadcast %cst_11 : f32 to vector<8x64xf32>
    %16 = arith.maximumf %14, %15 : vector<8x64xf32>
    %17 = arith.truncf %16 : vector<8x64xf32> to vector<8x64xbf16>
    %c0_12 = arith.constant 0 : index
    %c0_13 = arith.constant 0 : index
    %18 = vector.load %arg6[%c0_12, %c0_13] : memref<64x4xbf16, #tpu.memory_space<vmem>>, vector<64x4xbf16>
    %cst_14 = arith.constant dense<0.000000e+00> : vector<8x4xf32>
    %19 = tpu.matmul %17, %18, %cst_14 {dimension_numbers = #tpu.dot_dimension_numbers<[1], [0], [0], [1], [0, 0, 1, 1], [], []>} : vector<8x64xbf16>, vector<64x4xbf16>, vector<8x4xf32> -> vector<8x4xf32>
    %c0_15 = arith.constant 0 : index
    %c0_16 = arith.constant 0 : index
    %20 = vector.load %arg7[%c0_15, %c0_16] : memref<1x4xf32, #tpu.memory_space<vmem>>, vector<1x4xf32>
    %21 = vector.broadcast %20 : vector<1x4xf32> to vector<8x4xf32>
    %22 = arith.addf %19, %21 : vector<8x4xf32>
    %c0_17 = arith.constant 0 : index
    %c0_18 = arith.constant 0 : index
    %23 = vector.load %arg8[%c0_17, %c0_18] : memref<8x4xf32, #tpu.memory_space<vmem>>, vector<8x4xf32>
    tpu.vector_store %arg8[%c0_17, %c0_18], %22 {strides = array<i32>} : memref<8x4xf32, #tpu.memory_space<vmem>>, vector<8x4xf32>,
    return
  }
  func.func @transform_0(%arg0: i32) -> (i32, i32) {
    %c0_i32 = arith.constant 0 : i32
    %c0_i32_0 = arith.constant 0 : i32
    return %arg0, %c0_i32 : i32, i32
  }
  func.func @transform_1(%arg0: i32) -> (i32, i32) {
    %c0_i32 = arith.constant 0 : i32
    %c0_i32_0 = arith.constant 0 : i32
    %c0_i32_1 = arith.constant 0 : i32
    return %c0_i32, %c0_i32_0 : i32, i32
  }
  func.func @transform_2(%arg0: i32) -> (i32, i32) {
    %c0_i32 = arith.constant 0 : i32
    %c0_i32_0 = arith.constant 0 : i32
    %c0_i32_1 = arith.constant 0 : i32
    return %c0_i32, %c0_i32_0 : i32, i32
  }
  func.func @transform_3(%arg0: i32) -> (i32, i32) {
    %c0_i32 = arith.constant 0 : i32
    %c0_i32_0 = arith.constant 0 : i32
    %c0_i32_1 = arith.constant 0 : i32
    return %c0_i32, %c0_i32_0 : i32, i32
  }
  func.func @transform_4(%arg0: i32) -> (i32, i32) {
    %c0_i32 = arith.constant 0 : i32
    %c0_i32_0 = arith.constant 0 : i32
    %c0_i32_1 = arith.constant 0 : i32
    return %c0_i32, %c0_i32_0 : i32, i32
  }
  func.func @transform_5(%arg0: i32) -> (i32, i32) {
    %c0_i32 = arith.constant 0 : i32
    %c0_i32_0 = arith.constant 0 : i32
    %c0_i32_1 = arith.constant 0 : i32
    return %c0_i32, %c0_i32_0 : i32, i32
  }
  func.func @transform_6(%arg0: i32) -> (i32, i32) {
    %c0_i32 = arith.constant 0 : i32
    %c0_i32_0 = arith.constant 0 : i32
    %c0_i32_1 = arith.constant 0 : i32
    return %c0_i32, %c0_i32_0 : i32, i32
  }
  func.func @transform_7(%arg0: i32) -> (i32, i32) {
    %c0_i32 = arith.constant 0 : i32
    %c0_i32_0 = arith.constant 0 : i32
    return %arg0, %c0_i32 : i32, i32
  }
}

</mosaic_0001>

<bundles_post_ra>
// kernel: tpu_custom_call.1
= control target key start
LH: loop header
LB: loop body
LE: loop exit
PB: predicated region body
PF: predicated region fallthrough
CT: control target
= control target key end

     0   :  { %v405_v0 = vmov 0.0   ;;  %vm406_vm0 = vmmov 0   ;;  %vm60_vm1 = vcmask 392192   ;;  %vm258_vm2 = vcmask 523264   ;;  %s528_s1 = inlined_call_operand.vmem [shape: bf16[48,128], index: 1, kind: input, shape index: {}]   ;;  %s529_s3 = inlined_call_operand.vmem [shape: bf16[128,64], index: 3, kind: input, shape index: {}]   ;;  %s530_s0 = inlined_call_operand.vmem [shape: f32[8,48], index: 0, kind: input, shape index: {}]   ;;  %s531_s5 = inlined_call_operand.vmem [shape: bf16[64,4], index: 5, kind: input, shape index: {}]   ;;  %s532_s2 = inlined_call_operand.vmem [shape: f32[1,128], index: 2, kind: input, shape index: {}]   ;;  %s533_s4 = inlined_call_operand.vmem [shape: f32[1,64], index: 4, kind: input, shape index: {}]   ;;  %s534_s6 = inlined_call_operand.vmem [shape: f32[1,4], index: 6, kind: input, shape index: {}]   ;;  %s535_s7 = inlined_call_operand.vmem [shape: f32[8,4], index: 7, kind: output, shape index: {}]  }
   0x1   :  { %346 = vmatprep.subr.bf16.mxu0 %v405_v0  ;;  %v390_v1 = vld [vmem:[%s528_s1 + $0x10] sm:$0xff]   ;;  %352 = vmatprep.mubr.msk.bf16.mxu0 %vm406_vm0, %v405_v0  ;;  %v391_v2 = vld [vmem:[%s528_s1 + $0x8] sm:$0xff]   ;;  %v392_v3 = vld [vmem:[%s528_s1] sm:$0xff]   ;;  %vm302_vm3 = vcmask 31744  }
   0x2   :  { %356 = vmatprep.subr.bf16.mxu1 %v405_v0  ;;  %372 = vmatprep.mubr.msk.bf16.mxu1 %vm406_vm0, %v405_v0  ;;  %v393_v4 = vld [vmem:[%s529_s3 + $0x38] sm:$0xff]   ;;  %v27_v5 = vld [vmem:[%s530_s0] sm:$0xff]  ;;  %v394_v6 = vld [vmem:[%s529_s3 + $0x30] sm:$0xff]  }
   0x3   :  { %347 = vmatpush3.bf16.msra.mxu0 %v390_v1  ;;  %357 = vmatpush3.bf16.msra.mxu1 %v393_v4  ;;  %v28_v7 = vpack.c.bf16 %v27_v5, %v27_v5  ;;  %v395_v8 = vld [vmem:[%s529_s3 + $0x28] sm:$0xff]   ;;  %v396_v9 = vld [vmem:[%s529_s3 + $0x20] sm:$0xff]   ;;  %v397_v10 = vld [vmem:[%s529_s3 + $0x18] sm:$0xff]  }
   0x4   :  { %348 = vmatprep.subr.bf16.mxu0 %v405_v0  ;;  %358 = vmatprep.subr.bf16.mxu1 %v405_v0  ;;  %v398_v11 = vld [vmem:[%s529_s3 + $0x10] sm:$0xff]   ;;  %v399_v12 = vld [vmem:[%s529_s3 + $0x8] sm:$0xff]   ;;  %v400_v13 = vld [vmem:[%s529_s3] sm:$0xff]  }
   0x5   :  { %v401_v14 = vld [vmem:[%s531_s5 + $0x18] sm:$0xff]   ;;  %v402_v15 = vld [vmem:[%s531_s5 + $0x10] sm:$0xff]   ;;  %v308_v16 = vld [vmem:[%s532_s2] ss:$0 sm:$0xff] }
   0x6   :  { %v403_v24 = vld [vmem:[%s531_s5 + $0x8] sm:$0xff]   ;;  %v404_v25 = vld [vmem:[%s531_s5] sm:$0xff]  }
   0x7   :  { %349 = vmatpush3.bf16.msra.mxu0 %v391_v2  ;;  %359 = vmatpush3.bf16.msra.mxu1 %v394_v6  ;;  %v313_v26 = vld [vmem:[%s533_s4] ss:$0 sm:$0xff] }
   0x8   :  { %350 = vmatprep.subr.bf16.mxu0 %v405_v0  ;;  %360 = vmatprep.subr.bf16.mxu1 %v405_v0  ;;  %v322_v34 = vld [vmem:[%s534_s6] ss:$0 sm:$0xff] }
   0xb   :  { %351 = vmatpush3.bf16.msra.mxu0 %v392_v3  ;;  %361 = vmatpush3.bf16.msra.mxu1 %v395_v8 }
   0xc   :  { %376 = vmatprep.subr.bf16.mxu0 %v405_v0  ;;  %362 = vmatprep.subr.bf16.mxu1 %v405_v0 }
   0xe   :  { %353 = vmatmul.mubr.msk.bf16.vlgmr.msra.gmra.mxu0 %vm60_vm1, %v28_v7 }
   0xf   :  { %384 = vmatprep.mubr.msk.bf16.mxu0 %vm406_vm0, %v405_v0  ;;  %363 = vmatpush3.bf16.msra.mxu1 %v396_v9 }
  0x10   :  { %364 = vmatprep.subr.bf16.mxu1 %v405_v0  ;;  %377 = vmatpush3.bf16.msra.mxu0 %v401_v14 }
  0x11   :  { %378 = vmatprep.subr.bf16.mxu0 %v405_v0 }
  0x13   :  { %365 = vmatpush3.bf16.msra.mxu1 %v397_v10 }
  0x14   :  { %366 = vmatprep.subr.bf16.mxu1 %v405_v0  ;;  %379 = vmatpush3.bf16.msra.mxu0 %v402_v15 }
  0x15   :  { %380 = vmatprep.subr.bf16.mxu0 %v405_v0 }
  0x17   :  { %367 = vmatpush3.bf16.msra.mxu1 %v398_v11 }
  0x18   :  { %368 = vmatprep.subr.bf16.mxu1 %v405_v0  ;;  %381 = vmatpush3.bf16.msra.mxu0 %v403_v24 }
  0x19   :  { %382 = vmatprep.subr.bf16.mxu0 %v405_v0 }
  0x1b   :  { %369 = vmatpush3.bf16.msra.mxu1 %v399_v12 }
  0x1c   :  { %370 = vmatprep.subr.bf16.mxu1 %v405_v0  ;;  %383 = vmatpush3.bf16.msra.mxu0 %v404_v25 }
  0x1f   :  { %371 = vmatpush3.bf16.msra.mxu1 %v400_v13 }
  0xce   :  { %v98_v17 = vpop.f32.mrf.mxu0 }
  0xcf   :  { %v99_v18 = vadd.f32 %v308_v16, %v98_v17 }
  0xd0   :  { %v354_v19 = vpop.f32.mrf.mxu0 }
  0xd1   :  { %v104_v20 = vmax.f32 %v99_v18, 0.0 }
  0xd2   :  { %v101_v21 = vpop.f32.mrf.mxu0 }
  0xd3   :  { %v105_v22 = vpack.c.bf16 %v104_v20, %v104_v20 }
  0xd4   :  { %v355_v23 = vpop.f32.mrf.mxu0 }
  0xd5   :  { %373 = vmatmul.mubr.bf16.vlgmr.msra.gmra.mxu1 %v105_v22 }
 0x195   :  { %v211_v27 = vpop.f32.mrf.mxu1 }
 0x196   :  { %v212_v28 = vadd.f32 %v313_v26, %v211_v27 }
 0x197   :  { %v374_v29 = vpop.f32.mrf.mxu1 }
 0x198   :  { %v217_v30 = vmax.f32 %v212_v28, 0.0 }
 0x199   :  { %v214_v31 = vpop.f32.mrf.mxu1 }
 0x19a   :  { %v218_v32 = vpack.c.bf16 %v217_v30, %v217_v30 }
 0x19b   :  { %v375_v33 = vpop.f32.mrf.mxu1 }
 0x19c   :  { %385 = vmatmul.mubr.msk.bf16.vlgmr.msra.gmra.mxu0 %vm258_vm2, %v218_v32 }
 0x25c   :  { %v296_v35 = vpop.f32.mrf.mxu0 }
 0x25d   :  { %v297_v36 = vadd.f32 %v322_v34, %v296_v35 }
 0x25e   :  { %v386_v37 = vpop.f32.mrf.mxu0 }
 0x25f   :  { %303 = vst.msk [vmem:[%s535_s7] sm:$0xff] %vm302_vm3, %v297_v36 }
 0x260   :  { %v299_v38 = vpop.f32.mrf.mxu0 }
 0x262   :  { %v387_v39 = vpop.f32.mrf.mxu0 }

</bundles_post_ra>
